<compile_context>
chip_gen: v7x
topology: tpu7x:2x2x1
jax: 0.10.0
libtpu: 0.0.40
codegen_flags: <defaults>
</compile_context>

<pallas_src>
import functools
import math

import jax
import jax.numpy as jnp
from jax.experimental import pallas as pl
from jax.experimental.pallas import tpu as pltpu

_LANES = 128
_TARGET_PACKED_ROWS = 2048      # ~1 MiB f32 output block per grid step
_PALLAS_MIN_ELEMS = 1 << 20     # below ~4 MiB f32 output, plain XLA wins on dispatch


def _onehot_packed_kernel(idx_ref, out_ref, *, k: int):
    """idx_ref: (tile, 128) int8/int16/int32 -- hot column of the source row that
    owns each packed element (each source row's value repeated k times; padded
    source rows carry -1).  out_ref: (tile, 128) float32 -- the packed row-major
    flattening of the one-hot matrix.  Every block covers a whole number of
    source rows (tile*128 % k == 0), so the column of a packed element is just
    its block-local flat offset mod k (k is a compile-time constant)."""
    rows, lanes = out_ref.shape
    r = jax.lax.broadcasted_iota(jnp.int32, (rows, lanes), 0)
    c = jax.lax.broadcasted_iota(jnp.int32, (rows, lanes), 1)
    col = (r * lanes + c) % k
    out_ref[...] = (col == idx_ref[...].astype(jnp.int32)).astype(jnp.float32)


@functools.partial(jax.jit, static_argnums=(1, 2))
def _random_onehot_xla(key, num_rows: int, actn_size: int):
    """Small-problem fast path: a single fused XLA op, no Pallas dispatch."""
    n, k = int(num_rows), int(actn_size)
    idx = jax.random.randint(key, (n, 1), 0, k, dtype=jnp.int32)
    return (jax.lax.broadcasted_iota(jnp.int32, (n, k), 1) == idx).astype(jnp.float32)


@functools.partial(jax.jit, static_argnums=(1, 2))
def _random_onehot_pallas(key, num_rows: int, actn_size: int):
    """(num_rows, actn_size) float32 random one-hot via a lane-dense packed
    Pallas kernel: output is written as (padded_rows, 128) f32, the exact
    row-major flattening of the row-padded (n_pad, k) one-hot matrix."""
    n, k = int(num_rows), int(actn_size)

    # Source-row granularity chosen so that every block holds a whole number of
    # source rows AND the packed-row count is a multiple of 32 (legal int8
    # second-minor tiling): superstep * k is a multiple of 32 * 128.
    superstep = (32 * _LANES) // math.gcd(k, 32 * _LANES)
    ss_packed = (superstep * k) // _LANES            # packed rows per superstep
    total_ss = pl.cdiv(n, superstep)
    max_ss_per_tile = max(1, _TARGET_PACKED_ROWS // ss_packed)
    # Prefer >= 2 grid steps when there is enough work so the "parallel" axis
    # actually shards across v7x's two TensorCores.
    ss_per_tile = min(max_ss_per_tile, pl.cdiv(total_ss, 2)) if total_ss >= 2 else 1
    grid_n = pl.cdiv(total_ss, ss_per_tile)
    chunk_n = ss_per_tile * superstep                # source rows per grid step
    n_pad = grid_n * chunk_n                         # row-padded source rows
    tile = ss_per_tile * ss_packed                   # packed rows per grid step
    padded_rows = grid_n * tile                      # padded_rows*128 == n_pad*k

    # Random hot column per source row (== torch.randint(0, k, (n,))); fresh
    # key per call so successive calls draw new randoms like the torch module.
    idx = jax.random.randint(key, (n,), 0, k, dtype=jnp.int32)
    rep_dtype = jnp.int8 if k <= 127 else (jnp.int16 if k <= 32767 else jnp.int32)
    idx_pad = jnp.pad(idx, (0, n_pad - n), constant_values=-1).astype(rep_dtype)
    idx_rep = jnp.repeat(idx_pad, k).reshape(padded_rows, _LANES)

    itemsize = jnp.dtype(rep_dtype).itemsize
    packed = pl.pallas_call(
        functools.partial(_onehot_packed_kernel, k=k),
        out_shape=jax.ShapeDtypeStruct((padded_rows, _LANES), jnp.float32),
        grid=(grid_n,),
        in_specs=[pl.BlockSpec((tile, _LANES), lambda i: (i, 0))],
        out_specs=pl.BlockSpec((tile, _LANES), lambda i: (i, 0)),
        compiler_params=pltpu.CompilerParams(
            dimension_semantics=("parallel",)),
        cost_estimate=pl.CostEstimate(
            flops=4 * padded_rows * _LANES, transcendentals=0,
            bytes_accessed=padded_rows * _LANES * (4 + itemsize)),
    )(idx_rep)

    # (padded_rows, 128) is exactly the contiguous row-major flattening of the
    # row-padded (n_pad, k) matrix: free reshape + cheap leading-dim slice
    # (no element-wise prefix-slice pass over the whole output).
    out = packed.reshape(n_pad, k)
    return out if n_pad == n else out[:n]


def _random_onehot(key, num_rows: int, actn_size: int, force_pallas: bool = False):
    if force_pallas or num_rows * actn_size >= _PALLAS_MIN_ELEMS:
        return _random_onehot_pallas(key, num_rows, actn_size)
    return _random_onehot_xla(key, num_rows, actn_size)


class RandomModelPallas:
    """JAX/Pallas port of supervised_gym.models.RandomModel.

    No learnable parameters; the forward pass is a random one-hot action draw.
    Large draws go through the packed lane-dense Pallas kernel; small draws
    take a single fused XLA op (pure dispatch-overhead avoidance).  Random hot
    columns come from jax.random with a per-call key (the torch module uses
    torch's global RNG, so bit-identical streams are not expected).
    """

    def __init__(self, actn_size: int, h_size: int = 128, seed: int = 0, **kwargs):
        self.actn_size = actn_size
        self.h_size = h_size          # unused, kept for signature parity
        self._key = jax.random.PRNGKey(seed)

    def _next_key(self):
        self._key, sub = jax.random.split(self._key)
        return sub

    def step(self, x, force_pallas: bool = False):
        # x: (B, C, H, W) -> (B, actn_size)
        return _random_onehot(self._next_key(), x.shape[0], self.actn_size,
                              force_pallas=force_pallas)

    def forward(self, x, dones=None, force_pallas: bool = False):
        # x: (B, S, C, H, W) -> (B*S, actn_size)  (the torch code returns the
        # flattened (B*S, K) tensor, not (B, S, K))
        if x.ndim == 4:
            return self.step(x, force_pallas=force_pallas)
        b, s = x.shape[0], x.shape[1]
        return _random_onehot(self._next_key(), b * s, self.actn_size,
                              force_pallas=force_pallas)

    __call__ = forward


def _check_onehot(out, n, k):
    assert out.shape == (n, k), out.shape
    assert out.dtype == jnp.float32
    assert bool(jnp.all(jnp.sum(out, axis=-1) == 1.0))
    assert bool(jnp.all((out == 0.0) | (out == 1.0)))


if __name__ == "__main__":
    key = jax.random.PRNGKey(0)
    B, S, C, H, W = 2, 8, 4, 16, 16
    actn_size = 6

    model = RandomModelPallas(actn_size=actn_size, seed=1234)

    # Sequence path (force the Pallas kernel so it is exercised on TPU even at
    # demo sizes): (B, S, C, H, W) -> (B*S, actn_size)
    x_seq = jax.random.normal(key, (B, S, C, H, W), dtype=jnp.float32)
    out_seq = jax.block_until_ready(model(x_seq, force_pallas=True))
    _check_onehot(out_seq, B * S, actn_size)

    # Single-step path (forced Pallas): (B, C, H, W) -> (B, actn_size)
    x_step = jax.random.normal(jax.random.PRNGKey(1), (B, C, H, W), dtype=jnp.float32)
    out_step = jax.block_until_ready(model.step(x_step, force_pallas=True))
    _check_onehot(out_step, B, actn_size)

    # Default dispatch at these sizes takes the fused-XLA fast path.
    out_fast = jax.block_until_ready(model(x_seq))
    _check_onehot(out_fast, B * S, actn_size)

    # Multi-tile Pallas coverage (grid_n >= 2, row padding + leading-dim slice).
    out_big = jax.block_until_ready(
        _random_onehot_pallas(jax.random.PRNGKey(2), 50_000, actn_size))
    _check_onehot(out_big, 50_000, actn_size)

    print("KERNEL_OK")
</pallas_src>

<mosaic_0001>
module attributes {stable_mosaic.version = 11 : i64} {
  func.func @_onehot_packed_kernel(%arg0: i32, %arg1: memref<96x128xi8, #tpu.memory_space<vmem>>, %arg2: memref<96x128xf32, #tpu.memory_space<vmem>>) attributes {dimension_semantics = [#tpu.dimension_semantics<parallel>], iteration_bounds = array<i64: 1>, scalar_prefetch = 0 : i64, scratch_operands = 0 : i64, tpu.core_type = #tpu.core_type<tc>, window_params = [{transform_indices = @transform_0, window_bounds = array<i64: 96, 128>}, {transform_indices = @transform_1, window_bounds = array<i64: 96, 128>}]} {
    %0 = tpu.iota {dimensions = array<i32: 0>} : vector<96x128xi32>
    %1 = tpu.iota {dimensions = array<i32: 1>} : vector<96x128xi32>
    %c128_i32 = arith.constant 128 : i32
    %2 = vector.broadcast %c128_i32 : i32 to vector<96x128xi32>
    %3 = arith.muli %0, %2 : vector<96x128xi32>
    %4 = arith.addi %3, %1 : vector<96x128xi32>
    %c6_i32 = arith.constant 6 : i32
    %c0_i32 = arith.constant 0 : i32
    %5 = arith.cmpi eq, %c6_i32, %c0_i32 : i32
    %c1_i32 = arith.constant 1 : i32
    %6 = arith.select %5, %c1_i32, %c6_i32 : i32
    %7 = vector.broadcast %6 : i32 to vector<96x128xi32>
    %8 = arith.remsi %4, %7 : vector<96x128xi32>
    %c0_i32_0 = arith.constant 0 : i32
    %9 = vector.broadcast %c0_i32_0 : i32 to vector<96x128xi32>
    %10 = arith.cmpi ne, %8, %9 : vector<96x128xi32>
    %c0_i32_1 = arith.constant 0 : i32
    %11 = vector.broadcast %c0_i32_1 : i32 to vector<96x128xi32>
    %12 = arith.cmpi slt, %8, %11 : vector<96x128xi32>
    %c0_i32_2 = arith.constant 0 : i32
    %13 = arith.cmpi slt, %6, %c0_i32_2 : i32
    %14 = vector.broadcast %13 : i1 to vector<96x128xi1>
    %15 = vector.broadcast %14 : vector<96x128xi1> to vector<96x128xi1>
    %16 = arith.xori %12, %15 : vector<96x128xi1>
    %17 = arith.andi %16, %10 : vector<96x128xi1>
    %18 = vector.broadcast %6 : i32 to vector<96x128xi32>
    %19 = arith.addi %8, %18 : vector<96x128xi32>
    %20 = arith.select %17, %19, %8 : vector<96x128xi1>, vector<96x128xi32>
    %c0 = arith.constant 0 : index
    %c0_3 = arith.constant 0 : index
    %21 = vector.load %arg1[%c0, %c0_3] : memref<96x128xi8, #tpu.memory_space<vmem>>, vector<96x128xi8>
    %22 = arith.extsi %21 : vector<96x128xi8> to vector<96x128xi32>
    %23 = arith.cmpi eq, %20, %22 : vector<96x128xi32>
    %24 = arith.extui %23 : vector<96x128xi1> to vector<96x128xi32>
    %25 = arith.sitofp %24 : vector<96x128xi32> to vector<96x128xf32>
    %c0_4 = arith.constant 0 : index
    %c0_5 = arith.constant 0 : index
    %26 = vector.load %arg2[%c0_4, %c0_5] : memref<96x128xf32, #tpu.memory_space<vmem>>, vector<96x128xf32>
    tpu.vector_store %arg2[%c0_4, %c0_5], %25 {strides = array<i32>} : memref<96x128xf32, #tpu.memory_space<vmem>>, vector<96x128xf32>,
    return
  }
  func.func @transform_0(%arg0: i32) -> (i32, i32) {
    %c0_i32 = arith.constant 0 : i32
    %c0_i32_0 = arith.constant 0 : i32
    return %arg0, %c0_i32 : i32, i32
  }
  func.func @transform_1(%arg0: i32) -> (i32, i32) {
    %c0_i32 = arith.constant 0 : i32
    %c0_i32_0 = arith.constant 0 : i32
    return %arg0, %c0_i32 : i32, i32
  }
}

</mosaic_0001>

<bundles_post_ra>
// kernel: _random_onehot_pallas.1
= control target key start
LH: loop header
LB: loop body
LE: loop exit
PB: predicated region body
PF: predicated region fallthrough
CT: control target
= control target key end

     0   :  { %v8_v0 = vlaneseq  ;;  %s614_s0 = inlined_call_operand.vmem [shape: s8[96,128], index: 0, kind: input, shape index: {}]   ;;  %s615_s1 = inlined_call_operand.vmem [shape: f32[96,128], index: 1, kind: output, shape index: {}]  }
   0x1   :  { %v374_v4 = vld [vmem:[%s614_s0] sm:$0xff]  ;;  %v398_v22 = vld [vmem:[%s614_s0 + $0x8] sm:$0xff] }
   0x2   :  { %v366_v1 = vshrl.u32 %v8_v0, 7  ;;  %v368_v2 = vand.u32 127, %v8_v0  ;;  %v242_v14 = vunpack.c.0.s8 %v374_v4  ;;  %v243_v15 = vunpack.c.1.s8 %v374_v4 }
   0x3   :  { %v244_v21 = vunpack.c.2.s8 %v374_v4  ;;  %v245_v29 = vunpack.c.3.s8 %v374_v4  ;;  %v246_v33 = vunpack.c.0.s8 %v398_v22 }
   0x4   :  { %v23_v3 = vmul.u32 128, %v366_v1  ;;  %v10_v5 = vadd.s32 8, %v366_v1  ;;  %v11_v6 = vadd.s32 16, %v366_v1  ;;  %v12_v7 = vadd.s32 24, %v366_v1 }
   0x5   :  { %v13_v8 = vadd.s32 32, %v366_v1  ;;  %v14_v9 = vadd.s32 40, %v366_v1  ;;  %v15_v10 = vadd.s32 48, %v366_v1  ;;  %v16_v30 = vadd.s32 56, %v366_v1 }
   0x6   :  { %v383_v11 = vadd.s32 %v23_v3, %v368_v2  ;;  %v24_v12 = vmul.u32 128, %v10_v5  ;;  %v25_v13 = vmul.u32 128, %v11_v6  ;;  %v17_v34 = vadd.s32 64, %v366_v1 }
   0x7   :  { %v26_v16 = vmul.u32 128, %v12_v7  ;;  %v27_v17 = vmul.u32 128, %v13_v8 }
   0x8   :  { %v48_v18 = vsub.s32 0, %v383_v11  ;;  %v389_v19 = vadd.s32 %v24_v12, %v368_v2  ;;  %v392_v20 = vadd.s32 %v25_v13, %v368_v2  ;;  %v28_v25 = vmul.u32 128, %v14_v9 }
   0x9   :  { %v401_v23 = vadd.s32 %v26_v16, %v368_v2  ;;  %v404_v24 = vadd.s32 %v27_v17, %v368_v2  ;;  %v29_v26 = vmul.u32 128, %v15_v10  ;;  %v30_v46 = vmul.u32 128, %v16_v30 }
   0xa   :  { %v306_v27 = vmin.u32 %v48_v18, %v383_v11  ;;  %v59_v28 = vsub.s32 0, %v389_v19  ;;  %v70_v31 = vsub.s32 0, %v392_v20  ;;  %v422_v41 = vadd.s32 %v28_v25, %v368_v2 }
   0xb   :  { %v81_v32 = vsub.s32 0, %v401_v23  ;;  %v92_v38 = vsub.s32 0, %v404_v24  ;;  %v425_v42 = vadd.s32 %v29_v26, %v368_v2  ;;  %vm47_vm0 = vcmp.lt.s32.totalorder %v383_v11, 0 }
   0xc   :  { %v414_v35 = vmul.u32.u64.low 2863311531, %v306_v27  ;;  %v415_v36 = vmul.u32.u64.high 2863311531, %v306_v27, %v414_v35  ;;  %v307_v37 = vmin.u32 %v59_v28, %v389_v19  ;;  %v308_v39 = vmin.u32 %v70_v31, %v392_v20 }
   0xd   :  { %v309_v40 = vmin.u32 %v81_v32, %v401_v23  ;;  %v310_v45 = vmin.u32 %v92_v38, %v404_v24  ;;  %vm58_vm1 = vcmp.lt.s32.totalorder %v389_v19, 0  ;;  %v103_v54 = vsub.s32 0, %v422_v41 }
   0xe   :  { %v427_v43 = vmul.u32.u64.low 2863311531, %v307_v37  ;;  %v428_v44 = vmul.u32.u64.high 2863311531, %v307_v37, %v427_v43  ;;  %v431_v47 = vmul.u32.u64.low 2863311531, %v308_v39  ;;  %v432_v48 = vmul.u32.u64.high 2863311531, %v308_v39, %v431_v47 }
   0xf   :  { %v434_v49 = vmul.u32.u64.low 2863311531, %v309_v40  ;;  %v435_v50 = vmul.u32.u64.high 2863311531, %v309_v40, %v434_v49  ;;  %v53_v51 = vshrl.u32 %v415_v36, 2  ;;  %v114_v55 = vsub.s32 0, %v425_v42 }
  0x10   :  { %v439_v52 = vmul.u32.u64.low 2863311531, %v310_v45  ;;  %v440_v53 = vmul.u32.u64.high 2863311531, %v310_v45, %v439_v52  ;;  %v446_v56 = vadd.s32 %v30_v46, %v368_v2  ;;  %v64_v58 = vshrl.u32 %v428_v44, 2 }
  0x11   :  { %v54_v57 = vmul.u32 6, %v53_v51  ;;  %vm69_vm2 = vcmp.lt.s32.totalorder %v392_v20, 0  ;;  %v31_v59 = vmul.u32 128, %v17_v34  ;;  %v75_v60 = vshrl.u32 %v432_v48, 2 }
  0x12   :  { %vm80_vm3 = vcmp.lt.s32.totalorder %v401_v23, 0  ;;  %v86_v61 = vshrl.u32 %v435_v50, 2  ;;  %v454_v62 = vmin.u32 %v103_v54, %v422_v41  ;;  %v65_v0 = vmul.u32 6, %v64_v58 }
  0x13   :  { %v55_v63 = vsub.s32 %v306_v27, %v54_v57  ;;  %vm91_vm4 = vcmp.lt.s32.totalorder %v404_v24, 0  ;;  %v97_v3 = vshrl.u32 %v440_v53, 2  ;;  %v76_v5 = vmul.u32 6, %v75_v60 }
  0x14   :  { %v87_v6 = vmul.u32 6, %v86_v61  ;;  %v459_v7 = vmin.u32 %v114_v55, %v425_v42  ;;  %v125_v8 = vsub.s32 0, %v446_v56  ;;  %v66_v10 = vsub.s32 %v307_v37, %v65_v0 }
  0x15   :  { %v56_v9 = vsub.s32 0, %v55_v63  ;;  %v98_v12 = vmul.u32 6, %v97_v3  ;;  %v463_v13 = vadd.s32 %v31_v59, %v368_v2  ;;  %v77_v16 = vsub.s32 %v308_v39, %v76_v5 }
  0x16   :  { %v88_v17 = vsub.s32 %v309_v40, %v87_v6  ;;  %v466_v18 = vmul.u32.u64.low 2863311531, %v454_v62  ;;  %v467_v25 = vmul.u32.u64.high 2863311531, %v454_v62, %v466_v18  ;;  %v67_v27 = vsub.s32 0, %v66_v10 }
  0x17   :  { %v57_v26 = vsel %vm47_vm0, %v56_v9, %v55_v63  ;;  %v99_v28 = vsub.s32 %v310_v45, %v98_v12  ;;  %v472_v30 = vadd.s32 72, %v366_v1  ;;  %v78_v32 = vsub.s32 0, %v77_v16 }
  0x18   :  { %vm179_vm5 = vcmp.ne.s32.totalorder %v57_v26, 0  ;;  %vm191_vm6 = vcmp.lt.s32.totalorder %v57_v26, 0  ;;  %v215_v31 = vadd.s32 6, %v57_v26  ;;  %v68_v34 = vsel %vm58_vm1, %v67_v27, %v66_v10 }
  0x19   :  { %vm203_vm7 = vmand %vm191_vm6, %vm179_vm5  ;;  %v89_v35 = vsub.s32 0, %v88_v17  ;;  %v100_v36 = vsub.s32 0, %v99_v28  ;;  %v477_v37 = vmin.u32 %v125_v8, %v446_v56  ;;  %vm180_vm8 = vcmp.ne.s32.totalorder %v68_v34, 0 }
  0x1a   :  { %v227_v11 = vsel %vm203_vm7, %v215_v31, %v57_v26  ;;  %vm192_vm9 = vcmp.lt.s32.totalorder %v68_v34, 0  ;;  %v216_v38 = vadd.s32 6, %v68_v34  ;;  %v79_v39 = vsel %vm69_vm2, %v78_v32, %v77_v16 }
  0x1b   :  { %vm254_vm10 = vcmp.eq.s32.totalorder %v227_v11, %v242_v14  ;;  %vm204_vm11 = vmand %vm192_vm9, %vm180_vm8  ;;  %v90_v19 = vsel %vm80_vm3, %v89_v35, %v88_v17  ;;  %v101_v40 = vsel %vm91_vm4, %v100_v36, %v99_v28  ;;  %v355_v43 = vmov 0.0  }
  0x1c   :  { %v318_v44 = vsel %vm254_vm10, 1.0, %v355_v43  ;;  %v228_v45 = vsel %vm204_vm11, %v216_v38, %v68_v34  ;;  %vm181_vm12 = vcmp.ne.s32.totalorder %v79_v39, 0  ;;  %vm193_vm13 = vcmp.lt.s32.totalorder %v79_v39, 0 }
  0x1d   :  { %290 = vst [vmem:[%s615_s1] sm:$0xff] %v318_v44  ;;  %vm255_vm14 = vcmp.eq.s32.totalorder %v228_v45, %v243_v15  ;;  %vm205_vm15 = vmand %vm193_vm13, %vm181_vm12  ;;  %v217_v14 = vadd.s32 6, %v79_v39  ;;  %vm182_vm0 = vcmp.ne.s32.totalorder %v90_v19, 0  ;;  %vm194_vm1 = vcmp.lt.s32.totalorder %v90_v19, 0  ;;  %v569_v45 = vld [vmem:[%s614_s0 + $0x10] sm:$0xff] }
  0x1e   :  { %v319_v20 = vsel %vm255_vm14, 1.0, %v355_v43  ;;  %vm206_vm2 = vmand %vm194_vm1, %vm182_vm0  ;;  %v218_v23 = vadd.s32 6, %v90_v19  ;;  %vm183_vm3 = vcmp.ne.s32.totalorder %v101_v40, 0  ;;  %vm195_vm4 = vcmp.lt.s32.totalorder %v101_v40, 0 }
  0x1f   :  { %291 = vst [vmem:[%s615_s1 + $0x8] sm:$0xff] %v319_v20  ;;  %v229_v24 = vsel %vm205_vm15, %v217_v14, %v79_v39  ;;  %vm207_vm5 = vmand %vm195_vm4, %vm183_vm3  ;;  %v219_v46 = vadd.s32 6, %v101_v40  ;;  %v108_v47 = vshrl.u32 %v467_v25, 2  ;;  %v136_v15 = vsub.s32 0, %v463_v13 }
  0x20   :  { %vm256_vm6 = vcmp.eq.s32.totalorder %v229_v24, %v244_v21  ;;  %v230_v48 = vsel %vm206_vm2, %v218_v23, %v90_v19  ;;  %v502_v49 = vmul.u32.u64.low 2863311531, %v459_v7  ;;  %v503_v50 = vmul.u32.u64.high 2863311531, %v459_v7, %v502_v49 }
  0x21   :  { %v320_v51 = vsel %vm256_vm6, 1.0, %v355_v43  ;;  %vm257_vm7 = vcmp.eq.s32.totalorder %v230_v48, %v245_v29  ;;  %v231_v52 = vsel %vm207_vm5, %v219_v46, %v101_v40  ;;  %v109_v53 = vmul.u32 6, %v108_v47 }
  0x22   :  { %292 = vst [vmem:[%s615_s1 + $0x10] sm:$0xff] %v320_v51  ;;  %v321_v54 = vsel %vm257_vm7, 1.0, %v355_v43  ;;  %vm258_vm8 = vcmp.eq.s32.totalorder %v231_v52, %v246_v33  ;;  %v515_v21 = vmul.u32.u64.low 2863311531, %v477_v37  ;;  %v516_v55 = vmul.u32.u64.high 2863311531, %v477_v37, %v515_v21 }
  0x23   :  { %293 = vst [vmem:[%s615_s1 + $0x18] sm:$0xff] %v321_v54  ;;  %v322_v4 = vsel %vm258_vm8, 1.0, %v355_v43  ;;  %v110_v29 = vsub.s32 %v454_v62, %v109_v53  ;;  %v314_v57 = vmin.u32 %v136_v15, %v463_v13  ;;  %v32_v58 = vmul.u32 128, %v472_v30 }
  0x24   :  { %294 = vst [vmem:[%s615_s1 + $0x20] sm:$0xff] %v322_v4  ;;  %vm102_vm9 = vcmp.lt.s32.totalorder %v422_v41, 0  ;;  %v119_v33 = vshrl.u32 %v503_v50, 2  ;;  %v19_v59 = vadd.s32 80, %v366_v1  ;;  %v130_v3 = vshrl.u32 %v516_v55, 2 }
  0x25   :  { %v111_v60 = vsub.s32 0, %v110_v29  ;;  %v531_v61 = vmul.u32.u64.low 2863311531, %v314_v57  ;;  %v532_v63 = vmul.u32.u64.high 2863311531, %v314_v57, %v531_v61  ;;  %v535_v62 = vadd.s32 %v32_v58, %v368_v2 }
  0x26   :  { %v120_v0 = vmul.u32 6, %v119_v33  ;;  %v33_v5 = vmul.u32 128, %v19_v59  ;;  %v20_v6 = vadd.s32 88, %v366_v1  ;;  %v247_v41 = vunpack.c.1.s8 %v398_v22 }
  0x27   :  { %v112_v8 = vsel %vm102_vm9, %v111_v60, %v110_v29  ;;  %v248_v9 = vunpack.c.2.s8 %v398_v22  ;;  %v147_v10 = vsub.s32 0, %v535_v62  ;;  %vm113_vm13 = vcmp.lt.s32.totalorder %v425_v42, 0 }
  0x28   :  { %vm184_vm10 = vcmp.ne.s32.totalorder %v112_v8, 0  ;;  %vm196_vm11 = vcmp.lt.s32.totalorder %v112_v8, 0  ;;  %v220_v12 = vadd.s32 6, %v112_v8  ;;  %v121_v16 = vsub.s32 %v459_v7, %v120_v0 }
  0x29   :  { %vm208_vm12 = vmand %vm196_vm11, %vm184_vm10  ;;  %v131_v17 = vmul.u32 6, %v130_v3  ;;  %v141_v18 = vshrl.u32 %v532_v63, 2  ;;  %v315_v1 = vmin.u32 %v147_v10, %v535_v62  ;;  %v547_v27 = vadd.s32 %v33_v5, %v368_v2 }
  0x2a   :  { %v232_v25 = vsel %vm208_vm12, %v220_v12, %v112_v8  ;;  %v122_v26 = vsub.s32 0, %v121_v16  ;;  %v34_v28 = vmul.u32 128, %v20_v6  ;;  %vm124_vm15 = vcmp.lt.s32.totalorder %v446_v56, 0 }
  0x2b   :  { %vm259_vm14 = vcmp.eq.s32.totalorder %v232_v25, %v247_v41  ;;  %v132_v30 = vsub.s32 %v477_v37, %v131_v17  ;;  %v142_v7 = vmul.u32 6, %v141_v18  ;;  %v158_v38 = vsub.s32 0, %v547_v27 }
  0x2c   :  { %v323_v31 = vsel %vm259_vm14, 1.0, %v355_v43  ;;  %v123_v42 = vsel %vm113_vm13, %v122_v26, %v121_v16  ;;  %v552_v32 = vmul.u32.u64.low 2863311531, %v315_v1  ;;  %v553_v34 = vmul.u32.u64.high 2863311531, %v315_v1, %v552_v32 }
  0x2d   :  { %295 = vst [vmem:[%s615_s1 + $0x28] sm:$0xff] %v323_v31  ;;  %vm185_vm0 = vcmp.ne.s32.totalorder %v123_v42, 0  ;;  %vm197_vm1 = vcmp.lt.s32.totalorder %v123_v42, 0  ;;  %v221_v35 = vadd.s32 6, %v123_v42  ;;  %v133_v36 = vsub.s32 0, %v132_v30 }
  0x2e   :  { %vm209_vm2 = vmand %vm197_vm1, %vm185_vm0  ;;  %v143_v11 = vsub.s32 %v314_v57, %v142_v7  ;;  %v560_v37 = vadd.s32 %v34_v28, %v368_v2  ;;  %v249_v40 = vunpack.c.3.s8 %v398_v22  ;;  %vm135_vm3 = vcmp.lt.s32.totalorder %v463_v13, 0 }
  0x2f   :  { %v233_v39 = vsel %vm209_vm2, %v221_v35, %v123_v42  ;;  %v134_v19 = vsel %vm124_vm15, %v133_v36, %v132_v30  ;;  %v152_v56 = vshrl.u32 %v553_v34, 2  ;;  %v316_v20 = vmin.u32 %v158_v38, %v547_v27 }
  0x30   :  { %vm260_vm4 = vcmp.eq.s32.totalorder %v233_v39, %v248_v9  ;;  %vm186_vm5 = vcmp.ne.s32.totalorder %v134_v19, 0  ;;  %vm198_vm6 = vcmp.lt.s32.totalorder %v134_v19, 0  ;;  %v222_v44 = vadd.s32 6, %v134_v19 }
  0x31   :  { %v324_v2 = vsel %vm260_vm4, 1.0, %v355_v43  ;;  %vm210_vm7 = vmand %vm198_vm6, %vm186_vm5  ;;  %v144_v14 = vsub.s32 0, %v143_v11  ;;  %v169_v13 = vsub.s32 0, %v560_v37  ;;  %v250_v24 = vunpack.c.0.s8 %v569_v45 }
  0x32   :  { %296 = vst [vmem:[%s615_s1 + $0x30] sm:$0xff] %v324_v2  ;;  %v234_v22 = vsel %vm210_vm7, %v222_v44, %v134_v19  ;;  %v153_v46 = vmul.u32 6, %v152_v56  ;;  %v583_v49 = vmul.u32.u64.low 2863311531, %v316_v20  ;;  %v584_v50 = vmul.u32.u64.high 2863311531, %v316_v20, %v583_v49 }
  0x33   :  { %vm261_vm8 = vcmp.eq.s32.totalorder %v234_v22, %v249_v40  ;;  %v145_v23 = vsel %vm135_vm3, %v144_v14, %v143_v11  ;;  %v317_v51 = vmin.u32 %v169_v13, %v560_v37  ;;  %vm146_vm12 = vcmp.lt.s32.totalorder %v535_v62, 0 }
  0x34   :  { %v325_v47 = vsel %vm261_vm8, 1.0, %v355_v43  ;;  %vm187_vm9 = vcmp.ne.s32.totalorder %v145_v23, 0  ;;  %vm199_vm10 = vcmp.lt.s32.totalorder %v145_v23, 0  ;;  %v223_v15 = vadd.s32 6, %v145_v23 }
  0x35   :  { %297 = vst [vmem:[%s615_s1 + $0x38] sm:$0xff] %v325_v47  ;;  %vm211_vm11 = vmand %vm199_vm10, %vm187_vm9  ;;  %v154_v48 = vsub.s32 %v315_v1, %v153_v46  ;;  %v588_v54 = vmul.u32.u64.low 2863311531, %v317_v51  ;;  %v589_v21 = vmul.u32.u64.high 2863311531, %v317_v51, %v588_v54  ;;  %v251_v29 = vunpack.c.1.s8 %v569_v45 }
  0x36   :  { %v235_v52 = vsel %vm211_vm11, %v223_v15, %v145_v23  ;;  %v163_v57 = vshrl.u32 %v584_v50, 2  ;;  %vm157_vm2 = vcmp.lt.s32.totalorder %v547_v27, 0  ;;  %vm168_vm3 = vcmp.lt.s32.totalorder %v560_v37, 0 }
  0x37   :  { %vm262_vm13 = vcmp.eq.s32.totalorder %v235_v52, %v250_v24  ;;  %v155_v53 = vsub.s32 0, %v154_v48  ;;  %v174_v59 = vshrl.u32 %v589_v21, 2  ;;  %v252_v6 = vunpack.c.2.s8 %v569_v45 }
  0x38   :  { %v326_v55 = vsel %vm262_vm13, 1.0, %v355_v43  ;;  %v164_v33 = vmul.u32 6, %v163_v57  ;;  %v253_v10 = vunpack.c.3.s8 %v569_v45 }
  0x39   :  { %298 = vst [vmem:[%s615_s1 + $0x40] sm:$0xff] %v326_v55  ;;  %v156_v4 = vsel %vm146_vm12, %v155_v53, %v154_v48  ;;  %v175_v63 = vmul.u32 6, %v174_v59 }
  0x3a   :  { %vm188_vm14 = vcmp.ne.s32.totalorder %v156_v4, 0  ;;  %vm200_vm15 = vcmp.lt.s32.totalorder %v156_v4, 0  ;;  %v224_v58 = vadd.s32 6, %v156_v4  ;;  %v165_v61 = vsub.s32 %v316_v20, %v164_v33 }
  0x3b   :  { %vm212_vm0 = vmand %vm200_vm15, %vm188_vm14  ;;  %v176_v3 = vsub.s32 %v317_v51, %v175_v63 }
  0x3c   :  { %v236_v60 = vsel %vm212_vm0, %v224_v58, %v156_v4  ;;  %v166_v0 = vsub.s32 0, %v165_v61 }
  0x3d   :  { %vm263_vm1 = vcmp.eq.s32.totalorder %v236_v60, %v251_v29  ;;  %v177_v8 = vsub.s32 0, %v176_v3 }
  0x3e   :  { %v327_v62 = vsel %vm263_vm1, 1.0, %v355_v43  ;;  %v167_v5 = vsel %vm157_vm2, %v166_v0, %v165_v61 }
  0x3f   :  { %299 = vst [vmem:[%s615_s1 + $0x48] sm:$0xff] %v327_v62  ;;  %vm189_vm4 = vcmp.ne.s32.totalorder %v167_v5, 0  ;;  %vm201_vm5 = vcmp.lt.s32.totalorder %v167_v5, 0  ;;  %v225_v41 = vadd.s32 6, %v167_v5  ;;  %v178_v9 = vsel %vm168_vm3, %v177_v8, %v176_v3 }
  0x40   :  { %vm213_vm6 = vmand %vm201_vm5, %vm189_vm4  ;;  %vm190_vm7 = vcmp.ne.s32.totalorder %v178_v9, 0  ;;  %vm202_vm8 = vcmp.lt.s32.totalorder %v178_v9, 0  ;;  %v226_v16 = vadd.s32 6, %v178_v9 }
  0x41   :  { %v237_v12 = vsel %vm213_vm6, %v225_v41, %v167_v5  ;;  %vm214_vm10 = vmand %vm202_vm8, %vm190_vm7 }
  0x42   :  { %vm264_vm9 = vcmp.eq.s32.totalorder %v237_v12, %v252_v6  ;;  %v238_v18 = vsel %vm214_vm10, %v226_v16, %v178_v9 }
  0x43   :  { %v328_v17 = vsel %vm264_vm9, 1.0, %v355_v43  ;;  %vm265_vm11 = vcmp.eq.s32.totalorder %v238_v18, %v253_v10 }
  0x44   :  { %300 = vst [vmem:[%s615_s1 + $0x50] sm:$0xff] %v328_v17  ;;  %v329_v1 = vsel %vm265_vm11, 1.0, %v355_v43 }
  0x45   :  { %301 = vst [vmem:[%s615_s1 + $0x58] sm:$0xff] %v329_v1 }

</bundles_post_ra>
